<compile_context>
chip_gen: v7x
topology: tpu7x:2x2x1
jax: 0.10.0
libtpu: 0.0.40
codegen_flags: <defaults>
</compile_context>

<pallas_src>
import functools

import jax
import jax.numpy as jnp
from jax import lax
from jax.experimental import pallas as pl
from jax.experimental.pallas import tpu as pltpu


def _mlp_kernel(x_ref, w1_ref, b1_ref, w2_ref, b2_ref, o_ref, *, precision):
    """o = relu(x @ W1 + b1) @ W2 + b2 on one row-block (f32 accumulation)."""
    h = jnp.dot(x_ref[...], w1_ref[...],
                preferred_element_type=jnp.float32, precision=precision)
    h = jnp.maximum(h + b1_ref[...], 0.0)
    z = jnp.dot(h.astype(w2_ref.dtype), w2_ref[...],
                preferred_element_type=jnp.float32, precision=precision)
    o_ref[...] = (z + b2_ref[...]).astype(o_ref.dtype)


def _choose_rows_block(N, block_rows):
    """Pick (rows_per_block, num_programs).

    Single program for small N; otherwise an EVEN number of programs (>=2) so
    the 'parallel' grid axis can be split across both TensorCores on v7x,
    with the row tile rounded up to the 8-sublane granularity.
    """
    if N <= block_rows:
        return N, 1
    nprog = pl.cdiv(N, block_rows)
    if nprog % 2:                       # even program count -> balanced 2-TC split
        nprog += 1
    bn = pl.cdiv(N, nprog)
    bn = ((bn + 7) // 8) * 8            # sublane (8) alignment for the row tile
    nprog = pl.cdiv(N, bn)
    return bn, nprog


def genotype_encoder_forward(x, params, *, block_rows=16384,
                             compute_dtype=jnp.bfloat16):
    """x: (B, T, L) float32.  Returns (B, T, D) float32.

    compute_dtype=jnp.bfloat16 (default) halves the x HBM stream and uses a
    native bf16 MXU pass; compute_dtype=jnp.float32 reproduces the PyTorch
    module bit-for-practical-purposes (precision=HIGHEST on both dots).
    """
    w1, b1, w2, b2 = params
    B, T, L = x.shape
    H = w1.shape[1]
    D = w2.shape[1]
    N = B * T

    x2 = x.reshape(N, L).astype(compute_dtype)       # x.view(B*T, L)
    w1c = w1.astype(compute_dtype)
    w2c = w2.astype(compute_dtype)
    b1c = b1.astype(jnp.float32)
    b2c = b2.astype(jnp.float32)

    bn, nprog = _choose_rows_block(N, block_rows)

    precision = (lax.Precision.HIGHEST if compute_dtype == jnp.float32
                 else lax.Precision.DEFAULT)
    kernel = functools.partial(_mlp_kernel, precision=precision)

    # Advisory cost hint: this call is pure streaming (bandwidth-bound).
    x_bytes = jnp.dtype(compute_dtype).itemsize
    w_bytes = (L * H + H * D) * x_bytes + (H + D) * 4
    cost = pl.CostEstimate(
        flops=2 * N * (L * H + H * D),
        transcendentals=0,
        bytes_accessed=N * L * x_bytes + N * D * 4 + w_bytes,
    )

    # VMEM budget: double-buffered x/out tiles + (bn, H) f32 hidden + weights.
    # Floor at 32 MiB (>= every generation's scoped default we need), cap at
    # 48 MiB so it stays under v7x's 64 MiB/TC physical VMEM.
    vmem_needed = (2 * bn * L * x_bytes      # x tiles (double-buffered)
                   + 2 * bn * D * 4          # out tiles (double-buffered)
                   + bn * H * 4              # hidden activation
                   + 2 * w_bytes
                   + (1 << 20))              # slack
    vmem_limit = min(48 << 20, max(32 << 20, int(1.5 * vmem_needed)))

    out = pl.pallas_call(
        kernel,
        out_shape=jax.ShapeDtypeStruct((N, D), jnp.float32),
        grid_spec=pltpu.PrefetchScalarGridSpec(
            num_scalar_prefetch=0,
            grid=(nprog,),
            in_specs=[
                pl.BlockSpec((bn, L), lambda i: (i, 0)),   # x rows (streamed)
                pl.BlockSpec((L, H), lambda i: (0, 0)),    # W1 (in, out), resident
                pl.BlockSpec((1, H), lambda i: (0, 0)),    # b1, resident
                pl.BlockSpec((H, D), lambda i: (0, 0)),    # W2 (in, out), resident
                pl.BlockSpec((1, D), lambda i: (0, 0)),    # b2, resident
            ],
            out_specs=pl.BlockSpec((bn, D), lambda i: (i, 0)),
        ),
        compiler_params=pltpu.CompilerParams(
            dimension_semantics=("parallel",),             # rows independent
            vmem_limit_bytes=vmem_limit),
        cost_estimate=cost,
    )(x2, w1c, b1c, w2c, b2c)

    return out.reshape(B, T, D)                            # z.view(B, T, -1)


def init_params(key, L, D, H=64):
    """Mirror initialize_weights: kaiming_normal_ (fan_in, gain sqrt(2)) on the
    Linear weights, zero biases.  Weights stored (in, out) so the MLP is
    x @ W + b."""
    k1, k2 = jax.random.split(key)
    w1 = jnp.sqrt(2.0 / L) * jax.random.normal(k1, (L, H), jnp.float32)
    b1 = jnp.zeros((1, H), jnp.float32)
    w2 = jnp.sqrt(2.0 / H) * jax.random.normal(k2, (H, D), jnp.float32)
    b2 = jnp.zeros((1, D), jnp.float32)
    return (w1, b1, w2, b2)


def _reference(x, params):
    w1, b1, w2, b2 = params
    B, T, L = x.shape
    h = jnp.maximum(x.reshape(B * T, L) @ w1 + b1, 0.0)
    return (h @ w2 + b2).reshape(B, T, -1)


if __name__ == "__main__":
    B, T, L, D = 2, 8, 16, 32          # batch, seq, input dim L, output dim D
    key = jax.random.PRNGKey(0)
    k_x, k_p = jax.random.split(key)
    x = jax.random.normal(k_x, (B, T, L), jnp.float32)
    params = init_params(k_p, L, D)

    ref = _reference(x, params)

    # Exact-semantics f32 path (precision=HIGHEST on both MXU dots).
    z32 = jax.block_until_ready(
        genotype_encoder_forward(x, params, compute_dtype=jnp.float32))
    assert z32.shape == (B, T, D), z32.shape
    assert bool(jnp.all(jnp.isfinite(z32)))
    assert bool(jnp.allclose(z32, ref, atol=1e-5, rtol=1e-5))

    # bf16 fast path (default): halves the streamed x bytes, native bf16 MXU.
    zbf = jax.block_until_ready(
        genotype_encoder_forward(x, params, compute_dtype=jnp.bfloat16))
    assert zbf.shape == (B, T, D), zbf.shape
    assert bool(jnp.all(jnp.isfinite(zbf)))
    assert bool(jnp.allclose(zbf, ref, atol=5e-2, rtol=5e-2))

    print("KERNEL_OK")
</pallas_src>

<mosaic_0001>
module attributes {stable_mosaic.version = 11 : i64} {
  func.func @_mlp_kernel(%arg0: i32, %arg1: memref<16x16xf32, #tpu.memory_space<vmem>>, %arg2: memref<16x64xf32, #tpu.memory_space<vmem>>, %arg3: memref<1x64xf32, #tpu.memory_space<vmem>>, %arg4: memref<64x32xf32, #tpu.memory_space<vmem>>, %arg5: memref<1x32xf32, #tpu.memory_space<vmem>>, %arg6: memref<16x32xf32, #tpu.memory_space<vmem>>) attributes {dimension_semantics = [#tpu.dimension_semantics<parallel>], iteration_bounds = array<i64: 1>, scalar_prefetch = 0 : i64, scratch_operands = 0 : i64, tpu.core_type = #tpu.core_type<tc>, window_params = [{transform_indices = @transform_0, window_bounds = array<i64: 16, 16>}, {pipeline_mode = #tpu.pipeline_mode<synchronous>, transform_indices = @transform_1, window_bounds = array<i64: 16, 64>}, {pipeline_mode = #tpu.pipeline_mode<synchronous>, transform_indices = @transform_2, window_bounds = array<i64: 1, 64>}, {pipeline_mode = #tpu.pipeline_mode<synchronous>, transform_indices = @transform_3, window_bounds = array<i64: 64, 32>}, {pipeline_mode = #tpu.pipeline_mode<synchronous>, transform_indices = @transform_4, window_bounds = array<i64: 1, 32>}, {transform_indices = @transform_5, window_bounds = array<i64: 16, 32>}]} {
    %c0 = arith.constant 0 : index
    %c0_0 = arith.constant 0 : index
    %0 = vector.load %arg1[%c0, %c0_0] : memref<16x16xf32, #tpu.memory_space<vmem>>, vector<16x16xf32>
    %c0_1 = arith.constant 0 : index
    %c0_2 = arith.constant 0 : index
    %1 = vector.load %arg2[%c0_1, %c0_2] : memref<16x64xf32, #tpu.memory_space<vmem>>, vector<16x64xf32>
    %cst = arith.constant dense<0.000000e+00> : vector<16x64xf32>
    %2 = tpu.matmul %0, %1, %cst {dimension_numbers = #tpu.dot_dimension_numbers<[1], [0], [0], [1], [0, 0, 1, 1], [], []>, precision = #tpu.contract_precision<fp32>} : vector<16x16xf32>, vector<16x64xf32>, vector<16x64xf32> -> vector<16x64xf32>
    %c0_3 = arith.constant 0 : index
    %c0_4 = arith.constant 0 : index
    %3 = vector.load %arg3[%c0_3, %c0_4] : memref<1x64xf32, #tpu.memory_space<vmem>>, vector<1x64xf32>
    %4 = vector.broadcast %3 : vector<1x64xf32> to vector<16x64xf32>
    %5 = arith.addf %2, %4 : vector<16x64xf32>
    %cst_5 = arith.constant 0.000000e+00 : f32
    %6 = vector.broadcast %cst_5 : f32 to vector<16x64xf32>
    %7 = arith.maximumf %5, %6 : vector<16x64xf32>
    %c0_6 = arith.constant 0 : index
    %c0_7 = arith.constant 0 : index
    %8 = vector.load %arg4[%c0_6, %c0_7] : memref<64x32xf32, #tpu.memory_space<vmem>>, vector<64x32xf32>
    %cst_8 = arith.constant dense<0.000000e+00> : vector<16x32xf32>
    %9 = tpu.matmul %7, %8, %cst_8 {dimension_numbers = #tpu.dot_dimension_numbers<[1], [0], [0], [1], [0, 0, 1, 1], [], []>, precision = #tpu.contract_precision<fp32>} : vector<16x64xf32>, vector<64x32xf32>, vector<16x32xf32> -> vector<16x32xf32>
    %c0_9 = arith.constant 0 : index
    %c0_10 = arith.constant 0 : index
    %10 = vector.load %arg5[%c0_9, %c0_10] : memref<1x32xf32, #tpu.memory_space<vmem>>, vector<1x32xf32>
    %11 = vector.broadcast %10 : vector<1x32xf32> to vector<16x32xf32>
    %12 = arith.addf %9, %11 : vector<16x32xf32>
    %c0_11 = arith.constant 0 : index
    %c0_12 = arith.constant 0 : index
    %13 = vector.load %arg6[%c0_11, %c0_12] : memref<16x32xf32, #tpu.memory_space<vmem>>, vector<16x32xf32>
    tpu.vector_store %arg6[%c0_11, %c0_12], %12 {strides = array<i32>} : memref<16x32xf32, #tpu.memory_space<vmem>>, vector<16x32xf32>,
    return
  }
  func.func @transform_0(%arg0: i32) -> (i32, i32) {
    %c0_i32 = arith.constant 0 : i32
    %c0_i32_0 = arith.constant 0 : i32
    return %arg0, %c0_i32 : i32, i32
  }
  func.func @transform_1(%arg0: i32) -> (i32, i32) {
    %c0_i32 = arith.constant 0 : i32
    %c0_i32_0 = arith.constant 0 : i32
    %c0_i32_1 = arith.constant 0 : i32
    return %c0_i32, %c0_i32_0 : i32, i32
  }
  func.func @transform_2(%arg0: i32) -> (i32, i32) {
    %c0_i32 = arith.constant 0 : i32
    %c0_i32_0 = arith.constant 0 : i32
    %c0_i32_1 = arith.constant 0 : i32
    return %c0_i32, %c0_i32_0 : i32, i32
  }
  func.func @transform_3(%arg0: i32) -> (i32, i32) {
    %c0_i32 = arith.constant 0 : i32
    %c0_i32_0 = arith.constant 0 : i32
    %c0_i32_1 = arith.constant 0 : i32
    return %c0_i32, %c0_i32_0 : i32, i32
  }
  func.func @transform_4(%arg0: i32) -> (i32, i32) {
    %c0_i32 = arith.constant 0 : i32
    %c0_i32_0 = arith.constant 0 : i32
    %c0_i32_1 = arith.constant 0 : i32
    return %c0_i32, %c0_i32_0 : i32, i32
  }
  func.func @transform_5(%arg0: i32) -> (i32, i32) {
    %c0_i32 = arith.constant 0 : i32
    %c0_i32_0 = arith.constant 0 : i32
    return %arg0, %c0_i32 : i32, i32
  }
}

</mosaic_0001>

<bundles_post_ra>
// kernel: tpu_custom_call.1
= control target key start
LH: loop header
LB: loop body
LE: loop exit
PB: predicated region body
PF: predicated region fallthrough
CT: control target
= control target key end

     0   :  { %vm32_vm0 = vcmask 130048   ;;  %s1720_s0 = inlined_call_operand.vmem [shape: f32[16,16], index: 0, kind: input, shape index: {}]   ;;  %s1721_s1 = inlined_call_operand.vmem [shape: f32[16,64], index: 1, kind: input, shape index: {}]   ;;  %s1722_s2 = inlined_call_operand.vmem [shape: f32[1,64], index: 2, kind: input, shape index: {}]   ;;  %s1723_s3 = inlined_call_operand.vmem [shape: f32[64,32], index: 3, kind: input, shape index: {}]   ;;  %s1724_s4 = inlined_call_operand.vmem [shape: f32[1,32], index: 4, kind: input, shape index: {}]   ;;  %s1725_s5 = inlined_call_operand.hbm [shape: f32[16,32], index: 5, kind: output, shape index: {}]  }
   0x1   :  { %v23_v0 = vld [vmem:[%s1721_s1] sm:$0xff]  ;;  %v24_v1 = vld [vmem:[%s1721_s1 + $0x8] sm:$0xff]  ;;  %v545_v17 = vld [vmem:[%s1723_s3 + $0x10] sm:$0xff] }
   0x2   :  { %v21_v2 = vld [vmem:[%s1720_s0] sm:$0xff]  ;;  %v40_v3 = vand.u32 4294901760, %v23_v0  ;;  %v43_v4 = vand.u32 4294901760, %v24_v1  ;;  %v22_v5 = vld [vmem:[%s1720_s0 + $0x8] sm:$0xff]  ;;  %v546_v18 = vld [vmem:[%s1723_s3 + $0x18] sm:$0xff] }
   0x3   :  { %v34_v6 = vsel %vm32_vm0, %v21_v2, 0  ;;  %v1625_v7 = vld [vmem:[%s1723_s3] sm:$0xff]  ;;  %v544_v8 = vld [vmem:[%s1723_s3 + $0x8] sm:$0xff]  ;;  %v37_v9 = vsel %vm32_vm0, %v22_v5, 0 }
   0x4   :  { %v106_v10 = vand.u32 4294901760, %v34_v6  ;;  %v566_v11 = vand.u32 4294901760, %v1625_v7  ;;  %v569_v12 = vand.u32 4294901760, %v544_v8  ;;  %v1406_v13 = vpack.c.bf16 %v43_v4, %v40_v3 }
   0x5   :  { %v116_v14 = vand.u32 4294901760, %v37_v9  ;;  %v128_v15 = vsub.f32 %v23_v0, %v40_v3  ;;  %v135_v16 = vsub.f32 %v24_v1, %v43_v4 }
   0x6   :  { %10 = vsyncpa [#allocation3], 0  ;;  %v107_v19 = vsub.f32 %v34_v6, %v106_v10  ;;  %v1638_v20 = vsub.f32 %v1625_v7, %v566_v11  ;;  %v1640_v21 = vsub.f32 %v544_v8, %v569_v12  ;;  %1407 = vmatprep.subr.bf16.mxu0 %v1406_v13  ;;  %v572_v27 = vand.u32 4294901760, %v545_v17  ;;  %v547_v46 = vld [vmem:[%s1723_s3 + $0x20] sm:$0xff]  ;;  %v548_v47 = vld [vmem:[%s1723_s3 + $0x28] sm:$0xff]  ;;  %s1577_s17 = smov [#allocation2]  }
   0x7   :  { %v117_v22 = vsub.f32 %v37_v9, %v116_v14  ;;  %v129_v23 = vand.u32 4294901760, %v128_v15  ;;  %v136_v24 = vand.u32 4294901760, %v135_v16  ;;  %1409 = vmatpush3.bf16.msra.mxu0 %v1406_v13  ;;  %v575_v28 = vand.u32 4294901760, %v546_v18  ;;  %v549_v52 = vld [vmem:[%s1723_s3 + $0x30] sm:$0xff]  ;;  %v550_v53 = vld [vmem:[%s1723_s3 + $0x38] sm:$0xff]  ;;  %s1153_s18 = sshll.u32 %s1577_s17, 4  ;;  %s1154_s18 = int_to_ptr.vmem [resolvable:$true] %s1153_s18 }
   0x8   :  { %v108_v25 = vand.u32 4294901760, %v107_v19  ;;  %v1462_v26 = vpack.c.bf16 %v1640_v21, %v1638_v20  ;;  %v1644_v33 = vsub.f32 %v545_v17, %v572_v27  ;;  %v1414_v42 = vpack.c.bf16 %v135_v16, %v128_v15  ;;  %s1553_s19 = scalar_lea.vmem %s1154_s18, 256  ;;  %p1558_p1 = scmp.lt.s32.totalorder %s1154_s18, %s1154_s18 }
   0x9   :  { %v118_v29 = vand.u32 4294901760, %v117_v22  ;;  %v130_v30 = vsub.f32 %v128_v15, %v129_v23  ;;  %v137_v31 = vsub.f32 %v135_v16, %v136_v24  ;;  %v1646_v34 = vsub.f32 %v546_v18, %v575_v28  ;;  %p1554_p0 = scmp.ne.s32.totalorder %s1154_s18, %s1553_s19  ;;  %p1559_p2 = scmp.lt.s32.totalorder %s1553_s19, %s1553_s19 }
   0xa   :  { %v109_v32 = vsub.f32 %v107_v19, %v108_v25  ;;  %1463 = vmatprep.subr.bf16.mxu1 %v1462_v26  ;;  %v1422_v43 = vpack.c.bf16 %v136_v24, %v129_v23  ;;  %v1650_v44 = vpack.c.bf16 %v569_v12, %v566_v11  ;;  %v1653_v45 = vpack.c.bf16 %v575_v28, %v572_v27 }
   0xb   :  { %v119_v35 = vsub.f32 %v117_v22, %v118_v29  ;;  %v131_v36 = vand.u32 4294901760, %v130_v30  ;;  %v138_v37 = vand.u32 4294901760, %v137_v31  ;;  %1465 = vmatpush3.bf16.msra.mxu1 %v1462_v26  ;;  %v1466_v39 = vpack.c.bf16 %v1646_v34, %v1644_v33  ;;  %p1560_p3 = por %p1559_p2, %p1558_p1 }
   0xc   :  { %v110_v38 = vand.u32 4294901760, %v109_v32  ;;  %v578_v48 = vand.u32 4294901760, %v547_v46  ;;  %v581_v49 = vand.u32 4294901760, %v548_v47  ;;  %v584_v55 = vand.u32 4294901760, %v549_v52 }
   0xd   :  { %v120_v40 = vand.u32 4294901760, %v119_v35  ;;  %v1410_v41 = vpack.c.bf16 %v138_v37, %v131_v36  ;;  %1467 = vmatprep.subr.bf16.mxu1 %v1466_v39  ;;  %v587_v56 = vand.u32 4294901760, %v550_v53  ;;  %v661_v62 = vand.u32 4294901760, %v1638_v20  ;;  %p1561_p4 = pnand %p1560_p3, %p1554_p0 }
   0xe   :  { %1254 = vmatprep.mubr.f32.mxu0 %v110_v38  ;;  %v688_v50 = vsub.f32 %v547_v46, %v578_v48  ;;  %v695_v51 = vsub.f32 %v548_v47, %v581_v49  ;;  %v702_v57 = vsub.f32 %v549_v52, %v584_v55  ;;  %v1670_v60 = vpack.c.bf16 %v581_v49, %v578_v48 }
   0xf   :  { %1255 = vmatmul.mubr.f32.vlgmr.msra.gmra.mrb[0].mxu0 %v120_v40  ;;  %1411 = vmatprep.subr.bf16.mxu0 %v1410_v41  ;;  %v709_v58 = vsub.f32 %v550_v53, %v587_v56  ;;  %v1672_v61 = vpack.c.bf16 %v587_v56, %v584_v55  ;;  %v668_v63 = vand.u32 4294901760, %v1640_v21  ;;  %v662_v0 = vsub.f32 %v1638_v20, %v661_v62 }
  0x10   :  { %1413 = vmatpush3.bf16.msra.mxu0 %v1410_v41  ;;  %1261 = vmatprep.mubr.f32.mxu0 %v106_v10  ;;  %v1470_v54 = vpack.c.bf16 %v695_v51, %v688_v50  ;;  %v689_v5 = vand.u32 4294901760, %v688_v50  ;;  %v696_v6 = vand.u32 4294901760, %v695_v51  ;;  %v703_v11 = vand.u32 4294901760, %v702_v57 }
  0x11   :  { %1415 = vmatprep.subr.bf16.mxu0 %v1414_v42  ;;  %1469 = vmatpush3.bf16.msra.mxu1 %v1466_v39  ;;  %v1474_v59 = vpack.c.bf16 %v709_v58, %v702_v57  ;;  %v669_v1 = vsub.f32 %v1640_v21, %v668_v63  ;;  %v663_v2 = vand.u32 4294901760, %v662_v0  ;;  %v710_v12 = vand.u32 4294901760, %v709_v58 }
  0x12   :  { %1471 = vmatprep.subr.bf16.mxu1 %v1470_v54  ;;  %v690_v7 = vsub.f32 %v688_v50, %v689_v5  ;;  %v697_v8 = vsub.f32 %v695_v51, %v696_v6  ;;  %v1494_v16 = vpack.c.bf16 %v668_v63, %v661_v62  ;;  %v1502_v20 = vpack.c.bf16 %v696_v6, %v689_v5 }
  0x13   :  { %v670_v3 = vand.u32 4294901760, %v669_v1  ;;  %v711_v15 = vsub.f32 %v709_v58, %v710_v12  ;;  %v1506_v21 = vpack.c.bf16 %v710_v12, %v703_v11  ;;  %vm558_vm1 = vcmask 523264  }
  0x14   :  { %v691_v9 = vand.u32 4294901760, %v690_v7  ;;  %v682_v30 = vand.u32 4294901760, %v1646_v34  ;;  %vm1145_vm2 = vcmask 261120  }
  0x15   :  { %1473 = vmatpush3.bf16.msra.mxu1 %v1470_v54  ;;  %v1446_v4 = vpack.c.bf16 %v670_v3, %v663_v2  ;;  %v712_v18 = vand.u32 4294901760, %v711_v15 }
  0x16   :  { %1475 = vmatprep.subr.bf16.mxu1 %v1474_v59  ;;  %v683_v39 = vsub.f32 %v1646_v34, %v682_v30 }
  0x17   :  { %1262 = vmatmul.mubr.f32.vlgmr.msra.gmra.mrb[0].mxu0 %v116_v14 }
  0x18   :  { %1417 = vmatpush3.bf16.msra.mxu0 %v1414_v42  ;;  %1268 = vmatprep.mubr.f32.mxu0 %v107_v19  ;;  %v684_v47 = vand.u32 4294901760, %v683_v39 }
  0x19   :  { %1419 = vmatprep.subr.bf16.mxu0 %v1406_v13  ;;  %1477 = vmatpush3.bf16.msra.mxu1 %v1474_v59 }
  0x1a   :  { %1479 = vmatprep.subr.bf16.mxu1 %v1650_v44 }
  0x1f   :  { %1269 = vmatmul.mubr.f32.vlgmr.msra.gmra.mrb[0].mxu0 %v117_v22  ;;  %v1164_v22 = vld [vmem:[%s1722_s2] ss:$0 sm:$0xff] }
  0x20   :  { %1421 = vmatpush3.bf16.msra.mxu0 %v1406_v13  ;;  %1275 = vmatprep.mubr.f32.mxu0 %v108_v25 }
  0x21   :  { %1423 = vmatprep.subr.bf16.mxu0 %v1422_v43 }
  0x27   :  { %1276 = vmatmul.mubr.f32.vlgmr.msra.gmra.mrb[0].mxu0 %v118_v29  ;;  %v675_v29 = vand.u32 4294901760, %v1644_v33 }
  0x28   :  { %1425 = vmatpush3.bf16.msra.mxu0 %v1422_v43  ;;  %1282 = vmatprep.mubr.f32.mxu0 %v106_v10 }
  0x29   :  { %1427 = vmatprep.subr.bf16.mxu0 %v1406_v13  ;;  %v676_v38 = vsub.f32 %v1644_v33, %v675_v29  ;;  %v1498_v33 = vpack.c.bf16 %v682_v30, %v675_v29 }
  0x2b   :  { %v677_v46 = vand.u32 4294901760, %v676_v38 }
  0x2d   :  { %v1450_v51 = vpack.c.bf16 %v684_v47, %v677_v46 }
  0x2f   :  { %1283 = vmatmul.mubr.f32.vlgmr.msra.gmra.mrb[0].mxu0 %v116_v14 }
  0x30   :  { %1429 = vmatpush3.bf16.msra.mxu0 %v1406_v13  ;;  %1289 = vmatprep.mubr.f32.mxu0 %v106_v10  ;;  %v698_v10 = vand.u32 4294901760, %v697_v8 }
  0x31   :  { %1431 = vmatprep.subr.bf16.mxu0 %v1650_v44 }
  0x32   :  { %v1454_v13 = vpack.c.bf16 %v698_v10, %v691_v9 }
  0x37   :  { %1290 = vmatmul.mubr.f32.vlgmr.msra.gmra.mrb[0].mxu0 %v116_v14  ;;  %v704_v14 = vsub.f32 %v702_v57, %v703_v11 }
  0x38   :  { %1433 = vmatpush3.bf16.msra.mxu0 %v1650_v44 }
  0x39   :  { %1435 = vmatprep.subr.bf16.mxu0 %v1653_v45  ;;  %v705_v17 = vand.u32 4294901760, %v704_v14 }
  0x3b   :  { %v1458_v19 = vpack.c.bf16 %v712_v18, %v705_v17 }
  0x3c   :  { %1437 = vmatpush3.bf16.msra.mxu0 %v1653_v45 }
  0x3d   :  { %1439 = vmatprep.subr.bf16.mxu0 %v1670_v60 }
  0x40   :  { %1441 = vmatpush3.bf16.msra.mxu0 %v1670_v60 }
  0x41   :  { %1443 = vmatprep.subr.bf16.mxu0 %v1672_v61 }
  0x44   :  { %1445 = vmatpush3.bf16.msra.mxu0 %v1672_v61 }
  0x45   :  { %1447 = vmatprep.subr.bf16.mxu0 %v1446_v4 }
 0x10a   :  { %v1291_v23 = vpop.f32.mrb[0].mxu0 }
 0x10b   :  { %v1526_v24 = vadd.f32 %v1291_v23, %v1164_v22  ;;  %v531_v25 = vpop.f32.mrb[1].mxu0 }
 0x10c   :  { %v1527_v26 = vadd.f32 %v1164_v22, %v531_v25 }
 0x10d   :  { %v542_v27 = vmax.f32 %v1526_v24, 0.0 }
 0x10e   :  { %v541_v28 = vmax.f32 %v1527_v26, 0.0 }
 0x10f   :  { %v563_v31 = vsel %vm558_vm1, %v542_v27, 0 }
 0x110   :  { %v648_v32 = vand.u32 4294901760, %v563_v31  ;;  %v560_v35 = vsel %vm558_vm1, %v541_v28, 0 }
 0x111   :  { %v638_v36 = vand.u32 4294901760, %v560_v35 }
 0x112   :  { %v649_v37 = vsub.f32 %v563_v31, %v648_v32 }
 0x113   :  { %v639_v40 = vsub.f32 %v560_v35, %v638_v36 }
 0x114   :  { %v650_v41 = vand.u32 4294901760, %v649_v37 }
 0x115   :  { %1346 = vmatprep.mubr.f32.mxu1 %v639_v40  ;;  %v640_v42 = vand.u32 4294901760, %v639_v40 }
 0x116   :  { %1347 = vmatmul.mubr.f32.vlgmr.msra.gmra.mrb[0].mxu1 %v649_v37  ;;  %v651_v43 = vsub.f32 %v649_v37, %v650_v41 }
 0x117   :  { %1481 = vmatpush3.bf16.msra.mxu1 %v1650_v44  ;;  %1365 = vmatprep.mubr.f32.mxu1 %v640_v42  ;;  %v641_v48 = vsub.f32 %v639_v40, %v640_v42 }
 0x118   :  { %1483 = vmatprep.subr.bf16.mxu1 %v1653_v45  ;;  %v652_v50 = vand.u32 4294901760, %v651_v43 }
 0x119   :  { %v642_v49 = vand.u32 4294901760, %v641_v48 }
 0x11b   :  { %1485 = vmatpush3.bf16.msra.mxu1 %v1653_v45  ;;  %1308 = vmatprep.mubr.f32.mxu0 %v642_v49 }
 0x11c   :  { %1309 = vmatmul.mubr.f32.vlgmr.msra.gmra.mrb[2].mxu0 %v652_v50  ;;  %1487 = vmatprep.subr.bf16.mxu1 %v1670_v60 }
 0x11d   :  { %1449 = vmatpush3.bf16.msra.mxu0 %v1446_v4  ;;  %1327 = vmatprep.mubr.f32.mxu0 %v638_v36 }
 0x11e   :  { %1451 = vmatprep.subr.bf16.mxu0 %v1450_v51 }
 0x11f   :  { %1489 = vmatpush3.bf16.msra.mxu1 %v1670_v60 }
 0x120   :  { %1491 = vmatprep.subr.bf16.mxu1 %v1672_v61 }
 0x121   :  { %1453 = vmatpush3.bf16.msra.mxu0 %v1450_v51 }
 0x122   :  { %1455 = vmatprep.subr.bf16.mxu0 %v1454_v13 }
 0x123   :  { %1493 = vmatpush3.bf16.msra.mxu1 %v1672_v61 }
 0x124   :  { %1495 = vmatprep.subr.bf16.mxu1 %v1494_v16 }
 0x125   :  { %1457 = vmatpush3.bf16.msra.mxu0 %v1454_v13 }
 0x126   :  { %1366 = vmatmul.mubr.f32.vlgmr.msra.gmra.mrb[0].mxu1 %v650_v41  ;;  %1459 = vmatprep.subr.bf16.mxu0 %v1458_v19 }
 0x127   :  { %1497 = vmatpush3.bf16.msra.mxu1 %v1494_v16  ;;  %1384 = vmatprep.mubr.f32.mxu1 %v638_v36 }
 0x128   :  { %1499 = vmatprep.subr.bf16.mxu1 %v1498_v33 }
 0x129   :  { %1461 = vmatpush3.bf16.msra.mxu0 %v1458_v19 }
 0x12b   :  { %1501 = vmatpush3.bf16.msra.mxu1 %v1498_v33 }
 0x12c   :  { %1328 = vmatmul.mubr.f32.vlgmr.msra.gmra.mrb[2].mxu0 %v648_v32  ;;  %1503 = vmatprep.subr.bf16.mxu1 %v1502_v20 }
 0x12f   :  { %1505 = vmatpush3.bf16.msra.mxu1 %v1502_v20 }
 0x130   :  { %1507 = vmatprep.subr.bf16.mxu1 %v1506_v21 }
 0x133   :  { %1509 = vmatpush3.bf16.msra.mxu1 %v1506_v21 }
 0x134   :  { %1511 = vmatprep.subr.bf16.mxu1 %v1650_v44 }
 0x136   :  { %1385 = vmatmul.mubr.f32.vlgmr.msra.gmra.mrb[0].mxu1 %v648_v32 }
 0x137   :  { %1513 = vmatpush3.bf16.msra.mxu1 %v1650_v44  ;;  %1403 = vmatprep.mubr.f32.mxu1 %v638_v36  ;;  %v1165_v44 = vld [vmem:[%s1724_s4] ss:$0 sm:$0xff] }
 0x138   :  { %1515 = vmatprep.subr.bf16.mxu1 %v1653_v45 }
 0x13b   :  { %1517 = vmatpush3.bf16.msra.mxu1 %v1653_v45 }
 0x13c   :  { %1519 = vmatprep.subr.bf16.mxu1 %v1670_v60 }
 0x13f   :  { %1521 = vmatpush3.bf16.msra.mxu1 %v1670_v60 }
 0x140   :  { %1523 = vmatprep.subr.bf16.mxu1 %v1672_v61 }
 0x143   :  { %1525 = vmatpush3.bf16.msra.mxu1 %v1672_v61 }
 0x146   :  { %1404 = vmatmul.mubr.f32.vlgmr.msra.gmra.mrb[0].mxu1 %v648_v32 }
 0x1ff   :  { %v1329_v34 = vpop.f32.mrb[2].mxu0 }
 0x200   :  { %v765_v52 = vpop.f32.mrb[3].mxu0  ;;  %v1528_v53 = vadd.f32 %v1329_v34, %v1165_v44 }
 0x201   :  { %v1530_v54 = vadd.f32 %v1165_v44, %v765_v52 }
 0x219   :  { %v1405_v45 = vpop.f32.mrb[0].mxu1 }
 0x21a   :  { %v1529_v55 = vadd.f32 %v1528_v53, %v1405_v45  ;;  %v1135_v56 = vpop.f32.mrb[1].mxu1 }
 0x21b   :  { %v1531_v57 = vadd.f32 %v1530_v54, %v1135_v56 }
 0x21c   :  { %1147 = vst.msk [vmem:[#allocation2 + $0x8] sm:$0xff] %vm1145_vm2, %v1529_v55 }
 0x21d   :  { %1146 = vst.msk [vmem:[#allocation2] sm:$0xff] %vm1145_vm2, %v1531_v57 }
 0x21e   :  { %1564 = shalt.err (!%p1561_p4)
}
 0x21f   :  { %s1565_s21 = scalar_lea.hbm %s1725_s5, 256 }
 0x220   :  { %p1566_p5 = scmp.ne.s32.totalorder %s1725_s5, %s1565_s21  ;;  %p1569_p6 = scmp.lt.u32.totalorder %s1565_s21, %s1725_s5 }
 0x222   :  { %p1571_p7 = pnand %p1569_p6, %p1566_p5 }
 0x224   :  { %1574 = shalt.err (!%p1571_p7)
}
 0x225   :  { %s1578_s26 = smov 128   ;;  %s1579_s27 = smov 8  }
 0x226   :  { %1159 = dma.vmem_to_hbm [thread:$0]  %s1154_s18, 256, %s1725_s5, [#allocation3], %s1578_s26, %s1578_s26, %s1579_s27  }
 0x227   :  { %1575 = dma.done.wait [#allocation3], 256  }
 0x228   :  { %1576 = vsyncadd [#allocation3], 4294967040 }
 0x229   :  { %1163 = vsyncpa [#allocation3], 1 }

</bundles_post_ra>
